<compile_context>
chip_gen: v5e
topology: v5e:2x2
jax: 0.10.0
libtpu: 0.0.40
codegen_flags: <defaults>
</compile_context>

<pallas_src>
from functools import partial

import numpy as np
import jax
import jax.numpy as jnp
from jax.experimental import pallas as pl
from jax.experimental.pallas import tpu as pltpu

BN_EPS = 1e-5
LANE = 128
INT8_SUBLANE = 32          # int8 packs 4 rows/sublane -> keep N tiles 32-aligned


def _round_up(x, m):
    return ((x + m - 1) // m) * m


def _pick_tile(dim, target, align, prefer_two=True):
    """Tile size <= target, multiple of `align`.  When the aligned extent allows
    it, prefer >=2 tiles so a 'parallel' axis can shard across v7x's 2 TCs."""
    dim_a = _round_up(dim, align)
    t = min(_round_up(target, align), dim_a)
    if prefer_two and dim_a // t < 2 and dim_a >= 2 * align:
        t = _round_up((dim_a + 1) // 2, align)
    return t


# -----------------------------------------------------------------------------
# Stage 1: h = tanh(feat @ (w * s) + t)   (Linear + folded eval-BatchNorm + Tanh)
# feat/w are bf16 (MXU bf16 rate, half the feat DMA); accumulate + epilogue f32.
# -----------------------------------------------------------------------------
def _fc_kernel(feat_ref, w_ref, t_ref, h_ref):
    h = jnp.dot(feat_ref[...], w_ref[...], preferred_element_type=jnp.float32)
    h = jnp.tanh(h + t_ref[...])                     # f32 add + tanh (v5e-safe)
    h_ref[...] = h.astype(h_ref.dtype)               # store bf16, lane-dense E


# -----------------------------------------------------------------------------
# Stage 2: out = (mask @ h) * inv_rowsum   (mean aggregation, normalize after)
# mask arrives as int8 0/1 and is cast to bf16 just before the dot; the f32
# output block is resident across the k (U) axis and is the accumulator.
# -----------------------------------------------------------------------------
def _agg_kernel(mask_ref, h_ref, inv_ref, out_ref):
    k = pl.program_id(1)

    @pl.when(k == 0)
    def _():
        out_ref[...] = jnp.zeros_like(out_ref)

    m = mask_ref[...].astype(jnp.bfloat16)            # int8 0/1 -> bf16 (exact)
    out_ref[...] += jnp.dot(m, h_ref[...], preferred_element_type=jnp.float32)

    @pl.when(k == pl.num_programs(1) - 1)
    def _():
        out_ref[...] *= inv_ref[...]                  # precomputed 1/rowsum, (tn,1)


@partial(jax.jit, static_argnames=("tile_n", "tile_u"))
def mean_aggregator_forward(mask, unique_feats, w, b, gamma, beta, rmean, rvar,
                            *, tile_n=512, tile_u=1024):
    """mask: (N, U) 0/1 f32; unique_feats: (U, F); w: (F, E); rest: (1, E).
    Returns (N, E) f32."""
    N, U = mask.shape
    _, F = unique_feats.shape
    E = w.shape[1]

    # ---- fold Linear bias + eval-mode BatchNorm into scale/shift (tiny (1,E)) ----
    s = gamma * jax.lax.rsqrt(rvar + BN_EPS)          # (1, E)
    w_s = w * s                                       # (F, E) scale folded into weights
    t = beta + (b - rmean) * s                        # (1, E)

    # ---- precompute exact mean normalization once (O(N*U), trivial in XLA) ----
    rowsum = jnp.sum(mask, axis=1, keepdims=True)     # (N, 1)
    inv = 1.0 / jnp.maximum(rowsum, 1.0)              # guard all-zero (padded) rows

    # ---- tiling: lane-dense E, 128-aligned U, 32-aligned N (int8 mask) ----
    E_pad = _round_up(E, LANE)
    tu = _pick_tile(U, tile_u, LANE)
    tn = _pick_tile(N, tile_n, INT8_SUBLANE)

    # keep the stage-2 working set comfortably inside v7x's 64 MiB VMEM
    budget = 24 * 1024 * 1024
    def _stage2_bytes(tn_, tu_):
        return (2 * tn_ * tu_ * 1          # mask int8, double-buffered
                + 2 * tu_ * E_pad * 2      # h bf16, double-buffered
                + tn_ * E_pad * 4          # resident f32 out block
                + 2 * tn_ * 4)             # inv
    while _stage2_bytes(tn, tu) > budget and tu > LANE:
        tu = max(LANE, _round_up(tu // 2, LANE))
    while _stage2_bytes(tn, tu) > budget and tn > INT8_SUBLANE:
        tn = max(INT8_SUBLANE, _round_up(tn // 2, INT8_SUBLANE))

    U_pad = _round_up(U, tu)
    N_pad = _round_up(N, tn)

    # ---- padding + dtype casts (fused by jit; no eager f32 copies) ----
    w_p = jnp.zeros((F, E_pad), jnp.bfloat16).at[:, :E].set(w_s.astype(jnp.bfloat16))
    t_p = jnp.zeros((1, E_pad), jnp.float32).at[:, :E].set(t)
    feat_p = jnp.zeros((U_pad, F), jnp.bfloat16).at[:U, :].set(
        unique_feats.astype(jnp.bfloat16))
    mask_p = jnp.zeros((N_pad, U_pad), jnp.int8).at[:N, :U].set(
        mask.astype(jnp.int8))                        # 0/1 exact in int8
    inv_p = jnp.zeros((N_pad, 1), jnp.float32).at[:N, :].set(inv)

    cparams = dict(vmem_limit_bytes=48 * 1024 * 1024)

    # ---- stage 1: per-unique-node embeddings, computed once, U "parallel" ----
    h = pl.pallas_call(
        _fc_kernel,
        out_shape=jax.ShapeDtypeStruct((U_pad, E_pad), jnp.bfloat16),
        grid_spec=pltpu.PrefetchScalarGridSpec(
            num_scalar_prefetch=0,
            grid=(U_pad // tu,),
            in_specs=[pl.BlockSpec((tu, F), lambda i: (i, 0)),
                      pl.BlockSpec((F, E_pad), lambda i: (0, 0)),
                      pl.BlockSpec((1, E_pad), lambda i: (0, 0))],
            out_specs=pl.BlockSpec((tu, E_pad), lambda i: (i, 0))),
        compiler_params=pltpu.CompilerParams(
            dimension_semantics=("parallel",), **cparams),
    )(feat_p, w_p, t_p)

    # ---- stage 2: mean aggregation, N "parallel" / U reduction "arbitrary".
    # When U_pad == tu, h's block index is (0, 0) for the whole grid and Pallas
    # fetches it exactly once (VMEM-resident h).
    out = pl.pallas_call(
        _agg_kernel,
        out_shape=jax.ShapeDtypeStruct((N_pad, E_pad), jnp.float32),
        grid_spec=pltpu.PrefetchScalarGridSpec(
            num_scalar_prefetch=0,
            grid=(N_pad // tn, U_pad // tu),
            in_specs=[pl.BlockSpec((tn, tu), lambda i, k: (i, k)),       # int8 mask
                      pl.BlockSpec((tu, E_pad), lambda i, k: (k, 0)),    # bf16 h
                      pl.BlockSpec((tn, 1), lambda i, k: (i, 0))],       # f32 1/rowsum
            out_specs=pl.BlockSpec((tn, E_pad), lambda i, k: (i, 0))),
        compiler_params=pltpu.CompilerParams(
            dimension_semantics=("parallel", "arbitrary"), **cparams),
    )(mask_p, h, inv_p)

    return out[:N, :E]


# -----------------------------------------------------------------------------
# Host-side "glue" matching the PyTorch module: graph sampling + mask build.
# -----------------------------------------------------------------------------
def build_mask_and_unique(node_list, g, n_nbr_samples, rng):
    samples = []
    for node in node_list:
        nbrs = list(g[node])
        if len(nbrs) >= n_nbr_samples:
            picked = list(rng.choice(nbrs, n_nbr_samples, replace=False)) + [node]
        else:
            picked = nbrs + [node]
        samples.append([int(x) for x in picked])

    unique_nodes_list = sorted(set().union(*(set(s) for s in samples)))
    unique_nodes_dict = {n: i for i, n in enumerate(unique_nodes_list)}

    mask = np.zeros((len(samples), len(unique_nodes_list)), dtype=np.float32)
    for row, nbrs in enumerate(samples):
        for alter in nbrs:
            mask[row, unique_nodes_dict[alter]] = 1.0  # dupes collapse, like torch
    return mask, unique_nodes_list


if __name__ == "__main__":
    # ---- deterministic synthetic setup (small shapes) ----
    num_graph_nodes = 64
    feature_dim = 32
    emb_dim = 16
    n_nbr_samples = 4
    batch = 8

    np_rng = np.random.default_rng(0)
    g = {}
    for n in range(num_graph_nodes):
        deg = int(np_rng.integers(2, 8))
        nbrs = np_rng.choice(
            [m for m in range(num_graph_nodes) if m != n], size=deg, replace=False)
        g[n] = list(int(x) for x in nbrs)

    node_list = [int(x) for x in np_rng.choice(num_graph_nodes, size=batch, replace=False)]
    mask_np, unique_nodes = build_mask_and_unique(node_list, g, n_nbr_samples, np_rng)

    # ---- deterministic parameters / feature table via jax PRNG ----
    key = jax.random.PRNGKey(0)
    k_feat, k_w, k_b, k_g, k_be, k_m, k_v = jax.random.split(key, 7)

    feature_table = jax.random.normal(k_feat, (num_graph_nodes, feature_dim), jnp.float32)
    # nn.Linear(feature_dim, emb_dim): weight (E, F) -> stored transposed (F, E)
    w = jax.random.normal(k_w, (feature_dim, emb_dim), jnp.float32) * (1.0 / np.sqrt(feature_dim))
    b = jax.random.normal(k_b, (1, emb_dim), jnp.float32) * 0.1
    gamma = 1.0 + 0.1 * jax.random.normal(k_g, (1, emb_dim), jnp.float32)
    beta = 0.1 * jax.random.normal(k_be, (1, emb_dim), jnp.float32)
    rmean = 0.1 * jax.random.normal(k_m, (1, emb_dim), jnp.float32)
    rvar = jnp.abs(1.0 + 0.1 * jax.random.normal(k_v, (1, emb_dim), jnp.float32))

    # gather unique-node features (host-side glue, data-dependent)
    unique_feats = jnp.asarray(np.asarray(feature_table)[np.asarray(unique_nodes)])
    mask_j = jnp.asarray(mask_np)

    out = mean_aggregator_forward(mask_j, unique_feats, w, b, gamma, beta, rmean, rvar)
    out = jax.block_until_ready(out)
    assert out.shape == (batch, emb_dim)

    m_norm = mask_j / jnp.sum(mask_j, axis=1, keepdims=True)

    # ---- reference 1: numerics-matched (mirrors kernel's bf16 feed + bf16 h) ----
    s = gamma * jax.lax.rsqrt(rvar + BN_EPS)
    t_fold = beta + (b - rmean) * s
    feat_b = unique_feats.astype(jnp.bfloat16).astype(jnp.float32)
    w_b = (w * s).astype(jnp.bfloat16).astype(jnp.float32)
    h_match = jnp.tanh(feat_b @ w_b + t_fold).astype(jnp.bfloat16).astype(jnp.float32)
    ref_match = m_norm @ h_match
    np.testing.assert_allclose(np.asarray(out), np.asarray(ref_match),
                               rtol=5e-3, atol=5e-3)

    # ---- reference 2: original unfused f32 formulation (module semantics);
    #      looser tolerance accounts for the bf16 feed/storage in the kernel ----
    h_lin = unique_feats @ w + b
    h_bn = (h_lin - rmean) / jnp.sqrt(rvar + BN_EPS) * gamma + beta
    ref_f32 = m_norm @ jnp.tanh(h_bn)
    np.testing.assert_allclose(np.asarray(out), np.asarray(ref_f32),
                               rtol=3e-2, atol=3e-2)

    print("KERNEL_OK")
</pallas_src>

<mosaic_0001>
module attributes {stable_mosaic.version = 11 : i64} {
  func.func @_fc_kernel(%arg0: i32, %arg1: memref<128x32xbf16, #tpu.memory_space<vmem>>, %arg2: memref<32x128xbf16, #tpu.memory_space<vmem>>, %arg3: memref<1x128xf32, #tpu.memory_space<vmem>>, %arg4: memref<128x128xbf16, #tpu.memory_space<vmem>>) attributes {dimension_semantics = [#tpu.dimension_semantics<parallel>], iteration_bounds = array<i64: 1>, scalar_prefetch = 0 : i64, scratch_operands = 0 : i64, tpu.core_type = #tpu.core_type<tc>, window_params = [{transform_indices = @transform_0, window_bounds = array<i64: 128, 32>}, {pipeline_mode = #tpu.pipeline_mode<synchronous>, transform_indices = @transform_1, window_bounds = array<i64: 32, 128>}, {pipeline_mode = #tpu.pipeline_mode<synchronous>, transform_indices = @transform_2, window_bounds = array<i64: 1, 128>}, {transform_indices = @transform_3, window_bounds = array<i64: 128, 128>}]} {
    %c0 = arith.constant 0 : index
    %c0_0 = arith.constant 0 : index
    %0 = vector.load %arg1[%c0, %c0_0] : memref<128x32xbf16, #tpu.memory_space<vmem>>, vector<128x32xbf16>
    %c0_1 = arith.constant 0 : index
    %c0_2 = arith.constant 0 : index
    %1 = vector.load %arg2[%c0_1, %c0_2] : memref<32x128xbf16, #tpu.memory_space<vmem>>, vector<32x128xbf16>
    %cst = arith.constant dense<0.000000e+00> : vector<128x128xf32>
    %2 = tpu.matmul %0, %1, %cst {dimension_numbers = #tpu.dot_dimension_numbers<[1], [0], [0], [1], [0, 0, 1, 1], [], []>} : vector<128x32xbf16>, vector<32x128xbf16>, vector<128x128xf32> -> vector<128x128xf32>
    %c0_3 = arith.constant 0 : index
    %c0_4 = arith.constant 0 : index
    %3 = vector.load %arg3[%c0_3, %c0_4] : memref<1x128xf32, #tpu.memory_space<vmem>>, vector<1x128xf32>
    %4 = vector.broadcast %3 : vector<1x128xf32> to vector<128x128xf32>
    %5 = arith.addf %2, %4 : vector<128x128xf32>
    %6 = math.tanh %5 : vector<128x128xf32>
    %7 = arith.truncf %6 : vector<128x128xf32> to vector<128x128xbf16>
    %c0_5 = arith.constant 0 : index
    %c0_6 = arith.constant 0 : index
    %8 = vector.load %arg4[%c0_5, %c0_6] : memref<128x128xbf16, #tpu.memory_space<vmem>>, vector<128x128xbf16>
    tpu.vector_store %arg4[%c0_5, %c0_6], %7 {strides = array<i32>} : memref<128x128xbf16, #tpu.memory_space<vmem>>, vector<128x128xbf16>,
    return
  }
  func.func @transform_0(%arg0: i32) -> (i32, i32) {
    %c0_i32 = arith.constant 0 : i32
    %c0_i32_0 = arith.constant 0 : i32
    return %arg0, %c0_i32 : i32, i32
  }
  func.func @transform_1(%arg0: i32) -> (i32, i32) {
    %c0_i32 = arith.constant 0 : i32
    %c0_i32_0 = arith.constant 0 : i32
    %c0_i32_1 = arith.constant 0 : i32
    return %c0_i32, %c0_i32_0 : i32, i32
  }
  func.func @transform_2(%arg0: i32) -> (i32, i32) {
    %c0_i32 = arith.constant 0 : i32
    %c0_i32_0 = arith.constant 0 : i32
    %c0_i32_1 = arith.constant 0 : i32
    return %c0_i32, %c0_i32_0 : i32, i32
  }
  func.func @transform_3(%arg0: i32) -> (i32, i32) {
    %c0_i32 = arith.constant 0 : i32
    %c0_i32_0 = arith.constant 0 : i32
    return %arg0, %c0_i32 : i32, i32
  }
}

module attributes {stable_mosaic.version = 11 : i64} {
  func.func @_agg_kernel(%arg0: i32, %arg1: i32, %arg2: memref<32x128xi8, #tpu.memory_space<vmem>>, %arg3: memref<128x128xbf16, #tpu.memory_space<vmem>>, %arg4: memref<32x1xf32, #tpu.memory_space<vmem>>, %arg5: memref<32x128xf32, #tpu.memory_space<vmem>>) attributes {dimension_semantics = [#tpu.dimension_semantics<parallel>, #tpu.dimension_semantics<arbitrary>], iteration_bounds = array<i64: 1, 1>, scalar_prefetch = 0 : i64, scratch_operands = 0 : i64, tpu.core_type = #tpu.core_type<tc>, window_params = [{transform_indices = @transform_0, window_bounds = array<i64: 32, 128>}, {transform_indices = @transform_1, window_bounds = array<i64: 128, 128>}, {transform_indices = @transform_2, window_bounds = array<i64: 32, 1>}, {transform_indices = @transform_3, window_bounds = array<i64: 32, 128>}]} {
    %c0_i32 = arith.constant 0 : i32
    %0 = arith.cmpi eq, %arg1, %c0_i32 : i32
    %1 = arith.extui %0 : i1 to i32
    %c0_i32_0 = arith.constant 0 : i32
    %2 = arith.cmpi ne, %1, %c0_i32_0 : i32
    scf.if %2 {
      %cst_10 = arith.constant 0.000000e+00 : f32
      %13 = vector.broadcast %cst_10 : f32 to vector<32x128xf32>
      %c0_11 = arith.constant 0 : index
      %c0_12 = arith.constant 0 : index
      %14 = vector.load %arg5[%c0_11, %c0_12] : memref<32x128xf32, #tpu.memory_space<vmem>>, vector<32x128xf32>
      tpu.vector_store %arg5[%c0_11, %c0_12], %13 {strides = array<i32>} : memref<32x128xf32, #tpu.memory_space<vmem>>, vector<32x128xf32>,
    } else {
    }
    %c0 = arith.constant 0 : index
    %c0_1 = arith.constant 0 : index
    %3 = vector.load %arg2[%c0, %c0_1] : memref<32x128xi8, #tpu.memory_space<vmem>>, vector<32x128xi8>
    %4 = arith.sitofp %3 : vector<32x128xi8> to vector<32x128xbf16>
    %c0_2 = arith.constant 0 : index
    %c0_3 = arith.constant 0 : index
    %5 = vector.load %arg5[%c0_2, %c0_3] : memref<32x128xf32, #tpu.memory_space<vmem>>, vector<32x128xf32>
    %c0_4 = arith.constant 0 : index
    %c0_5 = arith.constant 0 : index
    %6 = vector.load %arg3[%c0_4, %c0_5] : memref<128x128xbf16, #tpu.memory_space<vmem>>, vector<128x128xbf16>
    %cst = arith.constant dense<0.000000e+00> : vector<32x128xf32>
    %7 = tpu.matmul %4, %6, %cst {dimension_numbers = #tpu.dot_dimension_numbers<[1], [0], [0], [1], [0, 0, 1, 1], [], []>} : vector<32x128xbf16>, vector<128x128xbf16>, vector<32x128xf32> -> vector<32x128xf32>
    %8 = arith.addf %5, %7 : vector<32x128xf32>
    %c0_6 = arith.constant 0 : index
    %c0_7 = arith.constant 0 : index
    %9 = vector.load %arg5[%c0_6, %c0_7] : memref<32x128xf32, #tpu.memory_space<vmem>>, vector<32x128xf32>
    tpu.vector_store %arg5[%c0_6, %c0_7], %8 {strides = array<i32>} : memref<32x128xf32, #tpu.memory_space<vmem>>, vector<32x128xf32>,
    %c0_i32_8 = arith.constant 0 : i32
    %10 = arith.cmpi eq, %arg1, %c0_i32_8 : i32
    %11 = arith.extui %10 : i1 to i32
    %c0_i32_9 = arith.constant 0 : i32
    %12 = arith.cmpi ne, %11, %c0_i32_9 : i32
    scf.if %12 {
      %c0_10 = arith.constant 0 : index
      %c0_11 = arith.constant 0 : index
      %13 = vector.load %arg5[%c0_10, %c0_11] : memref<32x128xf32, #tpu.memory_space<vmem>>, vector<32x128xf32>
      %c0_12 = arith.constant 0 : index
      %c0_13 = arith.constant 0 : index
      %14 = vector.load %arg4[%c0_12, %c0_13] : memref<32x1xf32, #tpu.memory_space<vmem>>, vector<32x1xf32>
      %15 = vector.broadcast %14 : vector<32x1xf32> to vector<32x128xf32>
      %16 = arith.mulf %13, %15 : vector<32x128xf32>
      %c0_14 = arith.constant 0 : index
      %c0_15 = arith.constant 0 : index
      %17 = vector.load %arg5[%c0_14, %c0_15] : memref<32x128xf32, #tpu.memory_space<vmem>>, vector<32x128xf32>
      tpu.vector_store %arg5[%c0_14, %c0_15], %16 {strides = array<i32>} : memref<32x128xf32, #tpu.memory_space<vmem>>, vector<32x128xf32>,
    } else {
    }
    return
  }
  func.func @transform_0(%arg0: i32, %arg1: i32) -> (i32, i32) {
    %c0_i32 = arith.constant 0 : i32
    return %arg0, %arg1 : i32, i32
  }
  func.func @transform_1(%arg0: i32, %arg1: i32) -> (i32, i32) {
    %c0_i32 = arith.constant 0 : i32
    %c0_i32_0 = arith.constant 0 : i32
    return %arg1, %c0_i32 : i32, i32
  }
  func.func @transform_2(%arg0: i32, %arg1: i32) -> (i32, i32) {
    %c0_i32 = arith.constant 0 : i32
    %c0_i32_0 = arith.constant 0 : i32
    return %arg0, %c0_i32 : i32, i32
  }
  func.func @transform_3(%arg0: i32, %arg1: i32) -> (i32, i32) {
    %c0_i32 = arith.constant 0 : i32
    %c0_i32_0 = arith.constant 0 : i32
    return %arg0, %c0_i32 : i32, i32
  }
}

</mosaic_0001>

<bundles_post_ra>
// kernel: mean_aggregator_forward.3
= control target key start
LH: loop header
LB: loop body
LE: loop exit
PB: predicated region body
PF: predicated region fallthrough
CT: control target
= control target key end

     0   :  { %v223_v2 = vmov 0   ;;  %s295_s1 = inlined_call_operand.vmem [shape: bf16[128,128], index: 1, kind: input, shape index: {}]   ;;  %s296_s2 = inlined_call_operand.vmem [shape: f32[32,1], index: 2, kind: input, shape index: {}]   ;;  %s297_s0 = inlined_call_operand.vmem [shape: s8[32,128], index: 0, kind: input, shape index: {}]   ;;  %s298_s3 = inlined_call_operand.vmem [shape: f32[32,128], index: 3, kind: output, shape index: {}]  }
   0x1   :  { %v210_v0 = vld [vmem:[%s295_s1 + $0x38] sm:$0xff]  ;;  %v209_v1 = vld [vmem:[%s295_s1 + $0x30] sm:$0xff]  ;;  %222 = vset.pattern.permute.xlu1 %v223_v2  ;;  %221 = vset.pattern.permute.xlu0 %v223_v2  ;;  %v135_v4 = vld [vmem:[%s296_s2] sm:$0xff] }
   0x2   :  { %101 = vmatpush.bf16.msra.mxu0 %v210_v0  ;;  %211 = vmatpush.bf16.msra.mxu1 %v210_v0  ;;  %v137_v3 = vld [vmem:[%s296_s2 + $0x10] sm:$0xff]  ;;  %v208_v5 = vld [vmem:[%s295_s1 + $0x28] sm:$0xff]  ;;  %v138_v6 = vld [vmem:[%s296_s2 + $0x18] sm:$0xff] }
   0x3   :  { %151 = vperm.xlu1 %222, %v137_v3   ;;  %141 = vperm.xlu0 %221, %v135_v4   ;;  %v136_v7 = vld [vmem:[%s296_s2 + $0x8] sm:$0xff]  ;;  %v207_v8 = vld [vmem:[%s295_s1 + $0x20] sm:$0xff]  ;;  %v206_v9 = vld [vmem:[%s295_s1 + $0x18] sm:$0xff] }
   0x4   :  { %v205_v10 = vld [vmem:[%s295_s1 + $0x10] sm:$0xff]  ;;  %v22_v11 = vld [vmem:[%s297_s0] sm:$0xff]  ;;  %v204_v16 = vld [vmem:[%s295_s1 + $0x8] sm:$0xff] }
   0x5   :  { %v23_v12 = vunpack.c.0.s8 %v22_v11  ;;  %v24_v13 = vunpack.c.1.s8 %v22_v11  ;;  %v25_v14 = vunpack.c.2.s8 %v22_v11  ;;  %v26_v15 = vunpack.c.3.s8 %v22_v11  ;;  %v203_v21 = vld [vmem:[%s295_s1] sm:$0xff] }
   0x6   :  { %102 = vmatpush.bf16.msra.mxu0 %v209_v1  ;;  %212 = vmatpush.bf16.msra.mxu1 %v209_v1 }
   0x7   :  { %v27_v17 = vcvt.s32.f32 %v23_v12  ;;  %v28_v18 = vcvt.s32.f32 %v24_v13  ;;  %v29_v19 = vcvt.s32.f32 %v25_v14  ;;  %v30_v20 = vcvt.s32.f32 %v26_v15 }
   0x9   :  { %v31_v22 = vpack.c.bf16 %v28_v18, %v27_v17  ;;  %v32_v23 = vpack.c.bf16 %v30_v20, %v29_v19 }
   0xa   :  { %103 = vmatpush.bf16.msra.mxu0 %v208_v5  ;;  %213 = vmatpush.bf16.msra.mxu1 %v208_v5 }
   0xb   :  { %156 = vperm.xlu1 %222, %v138_v6   ;;  %146 = vperm.xlu0 %221, %v136_v7  }
   0xe   :  { %104 = vmatpush.bf16.msra.mxu0 %v207_v8  ;;  %214 = vmatpush.bf16.msra.mxu1 %v207_v8 }
  0x12   :  { %105 = vmatpush.bf16.msra.mxu0 %v206_v9  ;;  %215 = vmatpush.bf16.msra.mxu1 %v206_v9 }
  0x16   :  { %106 = vmatpush.bf16.msra.mxu0 %v205_v10  ;;  %216 = vmatpush.bf16.msra.mxu1 %v205_v10 }
  0x1a   :  { %107 = vmatpush.bf16.msra.mxu0 %v204_v16  ;;  %217 = vmatpush.bf16.msra.mxu1 %v204_v16 }
  0x1e   :  { %108 = vmatpush.bf16.msra.mxu0 %v203_v21  ;;  %218 = vmatpush.bf16.msra.mxu1 %v203_v21 }
  0x21   :  { %109 = vmatmul.bf16.vlgmr.msra.gmra.mxu0 %v31_v22  ;;  %114 = vmatmul.bf16.vlgmr.msra.gmra.mxu1 %v32_v23 }
  0x75   :  { %v152_v24 = vpop.permute.xlu1 %151  ;;  %v142_v25 = vpop.permute.xlu0 %141 }
  0x7d   :  { %v157_v32 = vpop.permute.xlu1 %156  ;;  %v147_v33 = vpop.permute.xlu0 %146 }
  0x9e   :  { %v110_v26 = vpop.f32.mrf.mxu0  ;;  %v115_v27 = vpop.f32.mrf.mxu1 }
  0x9f   :  { %v161_v28 = vmul.f32 %v152_v24, %v115_v27  ;;  %v159_v29 = vmul.f32 %v142_v25, %v110_v26 }
  0xa1   :  { %165 = vst [vmem:[%s298_s3 + $0x10] sm:$0xff] %v161_v28 }
  0xa2   :  { %163 = vst [vmem:[%s298_s3] sm:$0xff] %v159_v29 }
  0xa6   :  { %v112_v30 = vpop.f32.mrf.mxu0  ;;  %v117_v31 = vpop.f32.mrf.mxu1 }
  0xa7   :  { %v162_v34 = vmul.f32 %v157_v32, %v117_v31  ;;  %v160_v35 = vmul.f32 %v147_v33, %v112_v30 }
  0xa9   :  { %166 = vst [vmem:[%s298_s3 + $0x18] sm:$0xff] %v162_v34 }
  0xaa   :  { %164 = vst [vmem:[%s298_s3 + $0x8] sm:$0xff] %v160_v35 }

// kernel: mean_aggregator_forward.2
= control target key start
LH: loop header
LB: loop body
LE: loop exit
PB: predicated region body
PF: predicated region fallthrough
CT: control target
= control target key end

     0   :  { %vm91_vm0 = vcmask 261120   ;;  %s446_s1 = inlined_call_operand.vmem [shape: bf16[32,128], index: 1, kind: input, shape index: {}]   ;;  %s447_s0 = inlined_call_operand.vmem [shape: bf16[128,32], index: 0, kind: input, shape index: {}]   ;;  %s448_s2 = inlined_call_operand.vmem [shape: f32[1,128], index: 2, kind: input, shape index: {}]   ;;  %s449_s3 = inlined_call_operand.vmem [shape: bf16[128,128], index: 3, kind: output, shape index: {}]  }
   0x1   :  { %v274_v0 = vld [vmem:[%s446_s1 + $0x8] sm:$0xff]  ;;  %v273_v1 = vld [vmem:[%s446_s1] sm:$0xff]  ;;  %v267_v3 = vld [vmem:[%s447_s0 + $0x10] sm:$0xff] }
   0x2   :  { %122 = vmatpush.bf16.msra.mxu0 %v274_v0  ;;  %322 = vmatpush.bf16.msra.mxu1 %v274_v0  ;;  %v265_v2 = vld [vmem:[%s447_s0] sm:$0xff]  ;;  %v271_v5 = vld [vmem:[%s447_s0 + $0x30] sm:$0xff]  ;;  %v266_v6 = vld [vmem:[%s447_s0 + $0x8] sm:$0xff] }
   0x3   :  { %323 = vmatpush.bf16.msra.mxu2 %v274_v0  ;;  %324 = vmatpush.bf16.msra.mxu3 %v274_v0  ;;  %v269_v4 = vld [vmem:[%s447_s0 + $0x20] sm:$0xff]  ;;  %v268_v7 = vld [vmem:[%s447_s0 + $0x18] sm:$0xff]  ;;  %v270_v8 = vld [vmem:[%s447_s0 + $0x28] sm:$0xff] }
   0x4   :  { %v272_v9 = vld [vmem:[%s447_s0 + $0x38] sm:$0xff]  ;;  %v328_v12 = vld [vmem:[%s448_s2] ss:$0 sm:$0xff] }
   0x6   :  { %123 = vmatpush.bf16.msra.mxu0 %v273_v1  ;;  %325 = vmatpush.bf16.msra.mxu1 %v273_v1 }
   0x7   :  { %326 = vmatpush.bf16.msra.mxu2 %v273_v1  ;;  %327 = vmatpush.bf16.msra.mxu3 %v273_v1 }
   0x9   :  { %257 = vmatmul.msk.bf16.vlgmr.msra.gmra.mxu0 %vm91_vm0, %v265_v2  ;;  %259 = vmatmul.msk.bf16.vlgmr.msra.gmra.mxu1 %vm91_vm0, %v267_v3 }
   0xa   :  { %261 = vmatmul.msk.bf16.vlgmr.msra.gmra.mxu2 %vm91_vm0, %v269_v4  ;;  %263 = vmatmul.msk.bf16.vlgmr.msra.gmra.mxu3 %vm91_vm0, %v271_v5 }
  0x19   :  { %258 = vmatmul.msk.bf16.gmra.mxu0 %vm91_vm0, %v266_v6  ;;  %260 = vmatmul.msk.bf16.gmra.mxu1 %vm91_vm0, %v268_v7 }
  0x1a   :  { %262 = vmatmul.msk.bf16.gmra.mxu2 %vm91_vm0, %v270_v8  ;;  %264 = vmatmul.msk.bf16.gmra.mxu3 %vm91_vm0, %v272_v9 }
  0x86   :  { %v125_v10 = vpop.f32.mrf.mxu0  ;;  %v135_v11 = vpop.f32.mrf.mxu1 }
  0x87   :  { %v126_v13 = vadd.f32 %v328_v12, %v125_v10  ;;  %v136_v14 = vadd.f32 %v328_v12, %v135_v11 }
  0x89   :  { %329 = vtanh.f32 %v126_v13 }
  0x8a   :  { %331 = vtanh.f32 %v136_v14 }
  0x8d   :  { %v145_v15 = vpop.f32.mrf.mxu2  ;;  %v155_v16 = vpop.f32.mrf.mxu3 }
  0x8e   :  { %v127_v17 = vpop.f32.mrf.mxu0  ;;  %v137_v18 = vpop.f32.mrf.mxu1  ;;  %v146_v21 = vadd.f32 %v328_v12, %v145_v15  ;;  %v156_v22 = vadd.f32 %v328_v12, %v155_v16 }
  0x8f   :  { %v128_v19 = vadd.f32 %v328_v12, %v127_v17  ;;  %v138_v20 = vadd.f32 %v328_v12, %v137_v18  ;;  %v330_v25 = vpop.eup %329 }
  0x90   :  { %v332_v30 = vpop.eup %331 }
  0x91   :  { %333 = vtanh.f32 %v128_v19 }
  0x92   :  { %335 = vtanh.f32 %v138_v20 }
  0x93   :  { %337 = vtanh.f32 %v146_v21 }
  0x94   :  { %339 = vtanh.f32 %v156_v22 }
  0x95   :  { %v147_v23 = vpop.f32.mrf.mxu2  ;;  %v157_v24 = vpop.f32.mrf.mxu3 }
  0x96   :  { %v148_v26 = vadd.f32 %v328_v12, %v147_v23  ;;  %v158_v27 = vadd.f32 %v328_v12, %v157_v24  ;;  %v130_v28 = vpop.f32.mrf.mxu0  ;;  %v140_v29 = vpop.f32.mrf.mxu1 }
  0x97   :  { %v334_v31 = vpop.eup %333  ;;  %v131_v36 = vadd.f32 %v328_v12, %v130_v28  ;;  %v141_v38 = vadd.f32 %v328_v12, %v140_v29 }
  0x98   :  { %341 = vtanh.f32 %v148_v26  ;;  %v336_v32 = vpop.eup %335  ;;  %v278_v33 = vpack.c.bf16 %v334_v31, %v330_v25 }
  0x99   :  { %343 = vtanh.f32 %v158_v27  ;;  %v288_v34 = vpack.c.bf16 %v336_v32, %v332_v30  ;;  %v338_v35 = vpop.eup %337 }
  0x9a   :  { %279 = vst [vmem:[%s449_s3] sm:$0xff] %v278_v33   ;;  %v340_v37 = vpop.eup %339  ;;  %345 = vtanh.f32 %v131_v36 }
  0x9b   :  { %316 = vst [vmem:[%s449_s3 + $0x10] sm:$0xff] %v288_v34   ;;  %347 = vtanh.f32 %v141_v38 }
  0x9d   :  { %v150_v39 = vpop.f32.mrf.mxu2  ;;  %v160_v40 = vpop.f32.mrf.mxu3 }
  0x9e   :  { %v342_v41 = vpop.eup %341  ;;  %v132_v42 = vpop.f32.mrf.mxu0  ;;  %v151_v49 = vadd.f32 %v328_v12, %v150_v39  ;;  %v161_v50 = vadd.f32 %v328_v12, %v160_v40 }
  0x9f   :  { %v142_v43 = vpop.f32.mrf.mxu1  ;;  %v344_v44 = vpop.eup %343  ;;  %v298_v45 = vpack.c.bf16 %v342_v41, %v338_v35  ;;  %v133_v46 = vadd.f32 %v328_v12, %v132_v42 }
  0xa0   :  { %v143_v47 = vadd.f32 %v328_v12, %v142_v43  ;;  %v308_v48 = vpack.c.bf16 %v344_v44, %v340_v37  ;;  %v346_v53 = vpop.eup %345 }
  0xa1   :  { %318 = vst [vmem:[%s449_s3 + $0x20] sm:$0xff] %v298_v45   ;;  %349 = vtanh.f32 %v133_v46  ;;  %v348_v56 = vpop.eup %347 }
  0xa2   :  { %320 = vst [vmem:[%s449_s3 + $0x30] sm:$0xff] %v308_v48   ;;  %351 = vtanh.f32 %v143_v47 }
  0xa3   :  { %353 = vtanh.f32 %v151_v49 }
  0xa4   :  { %355 = vtanh.f32 %v161_v50 }
  0xa5   :  { %v152_v51 = vpop.f32.mrf.mxu2  ;;  %v162_v52 = vpop.f32.mrf.mxu3 }
  0xa6   :  { %v153_v54 = vadd.f32 %v328_v12, %v152_v51  ;;  %v163_v55 = vadd.f32 %v328_v12, %v162_v52 }
  0xa7   :  { %v350_v57 = vpop.eup %349 }
  0xa8   :  { %357 = vtanh.f32 %v153_v54  ;;  %v352_v58 = vpop.eup %351  ;;  %v283_v59 = vpack.c.bf16 %v350_v57, %v346_v53 }
  0xa9   :  { %359 = vtanh.f32 %v163_v55  ;;  %v293_v60 = vpack.c.bf16 %v352_v58, %v348_v56  ;;  %v354_v61 = vpop.eup %353 }
  0xaa   :  { %315 = vst [vmem:[%s449_s3 + $0x8] sm:$0xff] %v283_v59   ;;  %v356_v62 = vpop.eup %355 }
  0xab   :  { %317 = vst [vmem:[%s449_s3 + $0x18] sm:$0xff] %v293_v60  }
  0xae   :  { %v358_v63 = vpop.eup %357 }
  0xaf   :  { %v360_v0 = vpop.eup %359  ;;  %v303_v1 = vpack.c.bf16 %v358_v63, %v354_v61 }
  0xb0   :  { %v313_v2 = vpack.c.bf16 %v360_v0, %v356_v62 }
  0xb1   :  { %319 = vst [vmem:[%s449_s3 + $0x28] sm:$0xff] %v303_v1  }
  0xb2   :  { %321 = vst [vmem:[%s449_s3 + $0x38] sm:$0xff] %v313_v2  }

</bundles_post_ra>
